<compile_context>
chip_gen: v6e
topology: v6e:2x2x1
jax: 0.10.0
libtpu: 0.0.40
codegen_flags: <defaults>
</compile_context>

<pallas_src>
import jax
import jax.numpy as jnp
from jax import lax
from jax.experimental import pallas as pl
from jax.experimental.pallas import tpu as pltpu

LEAKY_SLOPE = 0.1
BN_EPS = 1e-5


def upsample_kernel(w_ref, p_ref, b_ref, o_ref, acc_ref):
    # (4*C_out, tk) @ (tk, tm) on the MXU, f32 accumulation in a VMEM scratch.
    @pl.when(pl.program_id(1) == 0)
    def _init():
        acc_ref[...] = jnp.zeros_like(acc_ref)

    acc_ref[...] += jnp.dot(w_ref[...], p_ref[...], preferred_element_type=jnp.float32)

    @pl.when(pl.program_id(1) == pl.num_programs(1) - 1)
    def _finalize():
        # BatchNorm scale is pre-folded into the weights; only the bias + LeakyReLU remain.
        y = acc_ref[...] + b_ref[...]
        o_ref[...] = jnp.where(y >= 0, y, LEAKY_SLOPE * y).astype(o_ref.dtype)


def _pick_tk(k_dim, max_tk=512):
    """Contraction tile: full K when small, else a 128-multiple divisor of K."""
    if k_dim <= max_tk:
        return k_dim
    for cand in (512, 384, 256, 128):
        if cand <= max_tk and k_dim % cand == 0:
            return cand
    return k_dim  # fall back to an un-tiled contraction


def upsample_forward(x, skip, weight, gamma, beta, running_mean, running_var, *, tm=512):
    n, c_in, h, w = x.shape
    c_out = weight.shape[1]
    hp, wp = h + 1, w + 1
    k_dim = 4 * c_in
    n_out = 4 * c_out
    m = n * hp * wp

    # ---- sub-pixel patch matrix P (K, M): P[ci*4 + a*2 + b, (n,p,q)] = x_pad[n, ci, p+a, q+b] ----
    xp = jnp.pad(x, ((0, 0), (0, 0), (1, 1), (1, 1)))
    taps = [xp[:, :, a:a + hp, b:b + wp] for a in (0, 1) for b in (0, 1)]   # 4 x (N, Cin, H+1, W+1)
    patches = jnp.stack(taps, axis=2)                                        # (N, Cin, 4, H+1, W+1)
    patches = jnp.transpose(patches, (1, 2, 0, 3, 4)).reshape(k_dim, m)      # (K, M)

    # ---- phase-stacked weight matrix (4*C_out, K):  W[ci, co, 2(1-a)+dy, 2(1-b)+dx] ----
    w6 = weight.reshape(c_in, c_out, 2, 2, 2, 2)[:, :, ::-1, :, ::-1, :]     # (ci, co, a, dy, b, dx)
    w_mat = jnp.transpose(w6, (3, 5, 1, 0, 2, 4)).reshape(n_out, k_dim)      # rows: (dy, dx, co)

    # ---- fold eval-mode BatchNorm: scale -> weights, bias -> epilogue ----
    inv_std = 1.0 / jnp.sqrt(running_var.astype(jnp.float32) + BN_EPS)
    scale = gamma.astype(jnp.float32) * inv_std                              # (C_out,)
    bias = beta.astype(jnp.float32) - running_mean.astype(jnp.float32) * scale
    w_mat = w_mat.astype(jnp.float32) * jnp.tile(scale, 4)[:, None]
    bias4 = jnp.tile(bias, 4).reshape(n_out, 1)

    # ---- bf16 streams, pad M so the lane-major grid tiles evenly ----
    tm = min(tm, pl.cdiv(m, 128) * 128)
    m_pad = pl.cdiv(m, tm) * tm
    patches = patches.astype(jnp.bfloat16)
    if m_pad != m:
        patches = jnp.pad(patches, ((0, 0), (0, m_pad - m)))
    w_mat = w_mat.astype(jnp.bfloat16)

    tk = _pick_tk(k_dim)
    nk = k_dim // tk
    grid = (m_pad // tm, nk)

    out = pl.pallas_call(
        upsample_kernel,
        out_shape=jax.ShapeDtypeStruct((n_out, m_pad), jnp.float32),
        grid_spec=pltpu.PrefetchScalarGridSpec(
            num_scalar_prefetch=0,
            grid=grid,
            in_specs=[
                pl.BlockSpec((n_out, tk), lambda i, kk: (0, kk)),   # weights (small, resident)
                pl.BlockSpec((tk, tm), lambda i, kk: (kk, i)),      # patches (lane-dense stream)
                pl.BlockSpec((n_out, 1), lambda i, kk: (0, 0)),     # BN bias (f32)
            ],
            out_specs=pl.BlockSpec((n_out, tm), lambda i, kk: (0, i)),
            scratch_shapes=[pltpu.VMEM((n_out, tm), jnp.float32)],
        ),
        compiler_params=pltpu.CompilerParams(
            dimension_semantics=("parallel", "arbitrary"),
            vmem_limit_bytes=48 * 1024 * 1024,
        ),
    )(w_mat, patches, bias4)

    # ---- pixel-shuffle + crop back to NCHW, then channel-concat with the skip (glue) ----
    out = out[:, :m].reshape(2, 2, c_out, n, hp, wp)         # (dy, dx, co, n, p, q)
    out = jnp.transpose(out, (3, 2, 4, 0, 5, 1))             # (n, co, p, dy, q, dx)
    out = out.reshape(n, c_out, 2 * hp, 2 * wp)[:, :, 1:2 * h + 1, 1:2 * w + 1]
    return jnp.concatenate([out.astype(x.dtype), skip], axis=1)


def reference_forward(x, skip, weight, gamma, beta, running_mean, running_var):
    # Pure-JAX reference (ConvTranspose via lhs-dilated conv), eval-mode BN, LeakyReLU, concat.
    w_t = jnp.transpose(weight[:, :, ::-1, ::-1], (1, 0, 2, 3))  # (C_out, C_in, 4, 4)
    y = lax.conv_general_dilated(
        x, w_t, window_strides=(1, 1), padding=[(2, 2), (2, 2)],
        lhs_dilation=(2, 2), dimension_numbers=("NCHW", "OIHW", "NCHW"))
    scale = gamma / jnp.sqrt(running_var + BN_EPS)
    bias = beta - running_mean * scale
    y = y * scale[None, :, None, None] + bias[None, :, None, None]
    y = jnp.where(y >= 0, y, LEAKY_SLOPE * y)
    return jnp.concatenate([y, skip], axis=1)


if __name__ == "__main__":
    key = jax.random.PRNGKey(0)
    k_x, k_skip, k_w = jax.random.split(key, 3)

    N, C_IN, C_OUT, H, W = 2, 4, 8, 16, 16
    C_SKIP = 4

    x = jax.random.normal(k_x, (N, C_IN, H, W), dtype=jnp.float32)
    skip = jax.random.normal(k_skip, (N, C_SKIP, 2 * H, 2 * W), dtype=jnp.float32)

    # Deterministic synthetic parameters (ConvTranspose2d weight: (C_in, C_out, 4, 4)).
    weight = 0.1 * jax.random.normal(k_w, (C_IN, C_OUT, 4, 4), dtype=jnp.float32)
    gamma = 1.0 + 0.1 * jnp.arange(C_OUT, dtype=jnp.float32)
    beta = 0.05 * jnp.arange(C_OUT, dtype=jnp.float32)
    running_mean = 0.02 * jnp.arange(C_OUT, dtype=jnp.float32)
    running_var = 1.0 + 0.05 * jnp.arange(C_OUT, dtype=jnp.float32)

    out = upsample_forward(x, skip, weight, gamma, beta, running_mean, running_var)
    out = jax.block_until_ready(out)

    ref = reference_forward(x, skip, weight, gamma, beta, running_mean, running_var)
    ref = jax.block_until_ready(ref)

    assert out.shape == (N, C_OUT + C_SKIP, 2 * H, 2 * W), out.shape
    # Patches/weights are streamed as bf16 (f32 accumulate) -> loosened tolerance vs f32 reference.
    assert jnp.allclose(out, ref, atol=5e-2, rtol=5e-2), "mismatch vs reference"

    print("KERNEL_OK")
</pallas_src>

<mosaic_0001>
module attributes {stable_mosaic.version = 11 : i64} {
  func.func @upsample_kernel(%arg0: i32, %arg1: i32, %arg2: memref<32x16xbf16, #tpu.memory_space<vmem>>, %arg3: memref<16x512xbf16, #tpu.memory_space<vmem>>, %arg4: memref<32x1xf32, #tpu.memory_space<vmem>>, %arg5: memref<32x512xf32, #tpu.memory_space<vmem>>, %arg6: memref<32x512xf32, #tpu.memory_space<vmem>>) attributes {dimension_semantics = [#tpu.dimension_semantics<parallel>, #tpu.dimension_semantics<arbitrary>], iteration_bounds = array<i64: 2, 1>, scalar_prefetch = 0 : i64, scratch_operands = 1 : i64, tpu.core_type = #tpu.core_type<tc>, window_params = [{transform_indices = @transform_0, window_bounds = array<i64: 32, 16>}, {transform_indices = @transform_1, window_bounds = array<i64: 16, 512>}, {pipeline_mode = #tpu.pipeline_mode<synchronous>, transform_indices = @transform_2, window_bounds = array<i64: 32, 1>}, {transform_indices = @transform_3, window_bounds = array<i64: 32, 512>}]} {
    %c0_i32 = arith.constant 0 : i32
    %0 = arith.cmpi eq, %arg1, %c0_i32 : i32
    %1 = arith.extui %0 : i1 to i32
    %c0_i32_0 = arith.constant 0 : i32
    %2 = arith.cmpi ne, %1, %c0_i32_0 : i32
    scf.if %2 {
      %cst_10 = arith.constant 0.000000e+00 : f32
      %12 = vector.broadcast %cst_10 : f32 to vector<32x512xf32>
      %c0_11 = arith.constant 0 : index
      %c0_12 = arith.constant 0 : index
      %13 = vector.load %arg6[%c0_11, %c0_12] : memref<32x512xf32, #tpu.memory_space<vmem>>, vector<32x512xf32>
      tpu.vector_store %arg6[%c0_11, %c0_12], %12 {strides = array<i32>} : memref<32x512xf32, #tpu.memory_space<vmem>>, vector<32x512xf32>,
    } else {
    }
    %c0 = arith.constant 0 : index
    %c0_1 = arith.constant 0 : index
    %3 = vector.load %arg6[%c0, %c0_1] : memref<32x512xf32, #tpu.memory_space<vmem>>, vector<32x512xf32>
    %c0_2 = arith.constant 0 : index
    %c0_3 = arith.constant 0 : index
    %4 = vector.load %arg2[%c0_2, %c0_3] : memref<32x16xbf16, #tpu.memory_space<vmem>>, vector<32x16xbf16>
    %c0_4 = arith.constant 0 : index
    %c0_5 = arith.constant 0 : index
    %5 = vector.load %arg3[%c0_4, %c0_5] : memref<16x512xbf16, #tpu.memory_space<vmem>>, vector<16x512xbf16>
    %cst = arith.constant dense<0.000000e+00> : vector<32x512xf32>
    %6 = tpu.matmul %4, %5, %cst {dimension_numbers = #tpu.dot_dimension_numbers<[1], [0], [0], [1], [0, 0, 1, 1], [], []>} : vector<32x16xbf16>, vector<16x512xbf16>, vector<32x512xf32> -> vector<32x512xf32>
    %7 = arith.addf %3, %6 : vector<32x512xf32>
    %c0_6 = arith.constant 0 : index
    %c0_7 = arith.constant 0 : index
    %8 = vector.load %arg6[%c0_6, %c0_7] : memref<32x512xf32, #tpu.memory_space<vmem>>, vector<32x512xf32>
    tpu.vector_store %arg6[%c0_6, %c0_7], %7 {strides = array<i32>} : memref<32x512xf32, #tpu.memory_space<vmem>>, vector<32x512xf32>,
    %c0_i32_8 = arith.constant 0 : i32
    %9 = arith.cmpi eq, %arg1, %c0_i32_8 : i32
    %10 = arith.extui %9 : i1 to i32
    %c0_i32_9 = arith.constant 0 : i32
    %11 = arith.cmpi ne, %10, %c0_i32_9 : i32
    scf.if %11 {
      %c0_10 = arith.constant 0 : index
      %c0_11 = arith.constant 0 : index
      %12 = vector.load %arg6[%c0_10, %c0_11] : memref<32x512xf32, #tpu.memory_space<vmem>>, vector<32x512xf32>
      %c0_12 = arith.constant 0 : index
      %c0_13 = arith.constant 0 : index
      %13 = vector.load %arg4[%c0_12, %c0_13] : memref<32x1xf32, #tpu.memory_space<vmem>>, vector<32x1xf32>
      %14 = vector.broadcast %13 : vector<32x1xf32> to vector<32x512xf32>
      %15 = arith.addf %12, %14 : vector<32x512xf32>
      %cst_14 = arith.constant 0.000000e+00 : f32
      %16 = vector.broadcast %cst_14 : f32 to vector<32x512xf32>
      %17 = arith.cmpf oge, %15, %16 : vector<32x512xf32>
      %cst_15 = arith.constant 1.000000e-01 : f32
      %18 = vector.broadcast %cst_15 : f32 to vector<32x512xf32>
      %19 = arith.mulf %18, %15 : vector<32x512xf32>
      %20 = arith.select %17, %15, %19 : vector<32x512xi1>, vector<32x512xf32>
      %c0_16 = arith.constant 0 : index
      %c0_17 = arith.constant 0 : index
      %21 = vector.load %arg5[%c0_16, %c0_17] : memref<32x512xf32, #tpu.memory_space<vmem>>, vector<32x512xf32>
      tpu.vector_store %arg5[%c0_16, %c0_17], %20 {strides = array<i32>} : memref<32x512xf32, #tpu.memory_space<vmem>>, vector<32x512xf32>,
    } else {
    }
    return
  }
  func.func @transform_0(%arg0: i32, %arg1: i32) -> (i32, i32) {
    %c0_i32 = arith.constant 0 : i32
    %c0_i32_0 = arith.constant 0 : i32
    return %c0_i32, %arg1 : i32, i32
  }
  func.func @transform_1(%arg0: i32, %arg1: i32) -> (i32, i32) {
    %c0_i32 = arith.constant 0 : i32
    return %arg1, %arg0 : i32, i32
  }
  func.func @transform_2(%arg0: i32, %arg1: i32) -> (i32, i32) {
    %c0_i32 = arith.constant 0 : i32
    %c0_i32_0 = arith.constant 0 : i32
    %c0_i32_1 = arith.constant 0 : i32
    return %c0_i32, %c0_i32_0 : i32, i32
  }
  func.func @transform_3(%arg0: i32, %arg1: i32) -> (i32, i32) {
    %c0_i32 = arith.constant 0 : i32
    %c0_i32_0 = arith.constant 0 : i32
    return %c0_i32, %arg0 : i32, i32
  }
}

</mosaic_0001>

<bundles_post_ra>
// kernel: tpu_custom_call.1
= control target key start
LH: loop header
LB: loop body
LE: loop exit
PB: predicated region body
PF: predicated region fallthrough
CT: control target
= control target key end

     0   :  { %8 = vsyncpa [#allocation4], 0  ;;  %s1110_s0 = inlined_call_operand.vmem [shape: bf16[32,16], index: 0, kind: input, shape index: {}]   ;;  %s1111_s1 = inlined_call_operand.hbm [shape: bf16[16,1024], index: 1, kind: input, shape index: {}]   ;;  %s1112_s2 = inlined_call_operand.vmem [shape: f32[32,1], index: 2, kind: input, shape index: {}]   ;;  %s1113_s3 = inlined_call_operand.hbm [shape: f32[32,1024], index: 3, kind: output, shape index: {}]  }
   0x1   :  { %10 = vsyncpa [#allocation4 + $0x1], 0 }
   0x2   :  { %11 = vsyncpa [#allocation5], 0 }
   0x3   :  { %13 = vsyncpa [#allocation5 + $0x1], 0  ;;  %s928_s12 = smov 0   ;;  %s930_s13 = smov 0  }
   0x4   :  { %s932_s14 = smov 0   ;;  %s934_s15 = smov 0  }
   0x5   :  { %s936_s16 = smov 0   ;;  %s938_s17 = smov 0  }
   0x6 LB: > { %s682_s18 = sadd.s32 4294967295, %s897_s17   ;;  %s683_s19 = sadd.s32 4294967294, %s897_s17   ;;  %s897_s17 = sphi %s938_s17, %s19_s17   ;;  %s893_s16 = sphi %s936_s16, %s1124_s16   ;;  %s889_s15 = sphi %s934_s15, %s1123_s15   ;;  %s885_s14 = sphi %s932_s14, %s1122_s14   ;;  %s881_s13 = sphi %s930_s13, %s1121_s13   ;;  %s877_s12 = sphi %s928_s12, %s1120_s12  }
   0x7   : > { %s31_s20 = sadd.s32 1, %s893_s16  ;;  %s66_s21 = sadd.s32 1, %s885_s14 }
   0x8   : > { %p33_p0 = scmp.ge.s32.totalorder %s31_s20, 2  ;;  %p73_p1 = scmp.ne.s32.totalorder %s885_s14, %s881_s13 }
   0x9   : > { %p74_p2 = scmp.eq.s32.totalorder %s897_s17, 0  ;;  %p79_p3 = scmp.ne.s32.totalorder %s881_s13, %s877_s12 }
   0xa   : > { %s1126_s20 = smov (%p33_p0, %s31_s20), 0  ;;  %p80_p5 = scmp.eq.s32.totalorder %s682_s18, 0 }
   0xb   : > { %p969_p4 = por %p74_p2, %p73_p1  ;;  %s62_s23 = ssub.s32 %s893_s16, %s1126_s20 }
   0xc   : > { %p124_p6 = scmp.eq.s32.totalorder %s682_s18, 1  ;;  %p64_p7 = scmp.eq.s32.totalorder %s62_s23, 0 }
   0xd   : > { %p975_p8 = por %p80_p5, %p79_p3  ;;  %p130_p10 = scmp.eq.s32.totalorder %s683_s19, 1 }
   0xe   : > { %p979_p9 = por %p124_p6, %p73_p1  ;;  %p722_p13 = scmp.lt.s32.totalorder %s897_s17, 2 }
   0xf   : > { %s984_s26 = scalar_select %p64_p7, %s885_s14, %s66_s21  }
  0x10   : > { %p986_p11 = por %p130_p10, %p79_p3  ;;  %s160_s28 = sand.u32 1, %s885_s14  }
  0x11   : > { %s687_s29 = sshll.u32 %s160_s28, 5  ;;  %s708_s30 = sshll.u32 %s893_s16, 8 }
  0x12   : > { %s173_s6 = scalar_lea.hbm %s1111_s1, %s708_s30  ;;  %s164_s7 = scalar_lea.vmem [#allocation3], %s687_s29 }
  0x13   : > { %s174_s8 = sshll.u32 %s164_s7, 4  ;;  %p999_p0 = pnand %p722_p13, %p969_p4  ;;  %s175_s8 = int_to_ptr.vmem [resolvable:$true] %s174_s8 }
  0x14   : > { %s161_s10 = scalar_lea.sflag [#allocation4], %s160_s28  ;;  %s802_s11 = scalar_lea.vmem %s175_s8, 512 }
  0x15   : > { %p791_p1 = pneg %p999_p0  ;;  %p803_p2 = scmp.ne.s32.totalorder %s175_s8, %s802_s11 }
  0x16   : > { %s899_s18 = smov [#allocation3]  }
  0x17   : > { %p805_p3 = pnand %p803_p2, %p791_p1  ;;  %s807_s19 = sshll.u32 %s899_s18, 4  ;;  %s808_s19 = int_to_ptr.vmem [resolvable:$false] %s807_s19 }
  0x18   : > { %s809_s21 = scalar_lea.vmem %s808_s19, 1024  ;;  %p810_p6 = scmp.lt.s32.totalorder %s175_s8, %s808_s19 }
  0x19   : > { %p806_p5 = pneg %p805_p3  ;;  %p811_p7 = scmp.lt.s32.totalorder %s809_s21, %s802_s11 }
  0x1b   : > { %p812_p10 = por %p811_p7, %p810_p6 }
  0x1d   : > { %p813_p12 = pnand %p812_p10, %p806_p5 }
  0x1f   : > { %816 = shalt.err (!%p813_p12)
}
  0x20   : > { %s900_s22 = smov 512   ;;  %s901_s23 = smov 256  }
  0x21   : > { %s902_s28 = smov 16   ;;  %p690_p4 = scmp.ge.s32.totalorder %s897_s17, 1 }
  0x22   : > { %717 = dma.hbm_to_vmem [thread:$0]  (!%p999_p0), %s173_s6, 512, %s175_s8, %s161_s10, %s900_s22, %s901_s23, %s902_s28  }
  0x23   : > { %p182_p13 = scmp.lt.s32.totalorder %s897_s17, 3 }
  0x25   : > { %p183_p1 = pnand %p690_p4, %p182_p13 }
  0x26   : > { %s1010_s29 = sand.u32 (!%p183_p1), 1, %s881_s13  }
  0x27   : > { %186 = sbr.rel (%p183_p1) target bundleno = 280 (0x118), region = 32  ;;  %s691_s30 = sshll.u32 (!%p183_p1), %s1010_s29, 5 }
  0x28   : > { %s189_s4 = scalar_lea.sflag (!%p183_p1), [#allocation4], %s1010_s29  ;;  %s192_s5 = scalar_lea.vmem (!%p183_p1), [#allocation3], %s691_s30 }
  0x2c   : > { %868 = dma.done.wait (%p975_p8), %s189_s4, 512  }
  0x2d   : > { %870 = vsyncadd (%p975_p8), %s189_s4, 4294966784  ;;  %v903_v0 = vmov 0   ;;  %v781_v1 = vld [vmem:[%s192_s5 + $0x4] ss:$16 sps:$4 sm:$0xff]   ;;  %v783_v2 = vld [vmem:[%s192_s5 + $0xc] ss:$16 sps:$4 sm:$0xff]  }
  0x2e   : > { %340 = vmatprep.mubr.bf16.mxu0 %v903_v0  ;;  %393 = vmatprep.mubr.bf16.mxu1 %v903_v0  ;;  %v785_v3 = vld [vmem:[%s192_s5] ss:$16 sps:$4 sm:$0xff]   ;;  %v786_v4 = vld [vmem:[%s192_s5 + $0x8] ss:$16 sps:$4 sm:$0xff]   ;;  %vm301_vm0 = vcmask 130048   ;;  %s692_s28 = sshll.u32 %s1010_s29, 7 }
  0x2f   : > { %779 = vset.pattern.permute.xlu0 %v903_v0  ;;  %780 = vset.pattern.permute.xlu1 %v903_v0  ;;  %v787_v5 = vld [vmem:[%s1110_s0] sm:$0xff]   ;;  %v467_v7 = vld [vmem:[%s1112_s2 + $0x10] sm:$0xff]  ;;  %v466_v8 = vld [vmem:[%s1112_s2 + $0x8] sm:$0xff]  ;;  %s1037_s30 = scalar_lea.vmem [#allocation6], %s692_s28  ;;  %s709_s4 = sshll.u32 %s889_s15, 9 }
  0x30   : > { %322 = vmatprep.subr.bf16.mxu0 %v781_v1  ;;  %375 = vmatprep.subr.bf16.mxu1 %v783_v2  ;;  %v465_v6 = vld [vmem:[%s1112_s2] sm:$0xff]  ;;  %v468_v9 = vld [vmem:[%s1112_s2 + $0x18] sm:$0xff]  ;;  %v788_v10 = vld [vmem:[%s1110_s0 + $0x8] sm:$0xff]   ;;  %s583_s5 = sshll.u32 %s1037_s30, 4  ;;  %s1058_s7 = scalar_lea.hbm %s1113_s3, %s709_s4  ;;  %s1060_s5 = int_to_ptr.vmem [resolvable:$true] %s583_s5 }
  0x31   : > { %323 = vmatpush1.bf16.msra.mxu0 %v785_v3  ;;  %376 = vmatpush1.bf16.msra.mxu1 %v786_v4  ;;  %s570_s24 = scalar_lea.sflag [#allocation5], %s1010_s29  ;;  %s817_s8 = scalar_lea.vmem %s1060_s5, 2048 }
  0x32   : > { %471 = vperm.xlu0 %779, %v465_v6   ;;  %481 = vperm.xlu1 %780, %v467_v7   ;;  %p818_p8 = scmp.ne.s32.totalorder %s1060_s5, %s817_s8  ;;  %s904_s9 = smov [#allocation6]  }
  0x33   : > { %s821_s10 = sshll.u32 %s904_s9, 4  ;;  %s822_s10 = int_to_ptr.vmem [resolvable:$false] %s821_s10 }
  0x34   : > { %699 = vmatmul.mubr.msk.bf16.vlgmr.msra.gmra.mxu0 %vm301_vm0, %v787_v5  ;;  %701 = vmatmul.mubr.msk.bf16.vlgmr.msra.gmra.mxu1 %vm301_vm0, %v787_v5  ;;  %p819_p12 = pnand %p818_p8, %p979_p9  ;;  %s823_s11 = scalar_lea.vmem %s822_s10, 4096 }
  0x35   : > { %350 = vmatprep.mubr.bf16.mxu0 %v903_v0  ;;  %403 = vmatprep.mubr.bf16.mxu1 %v903_v0  ;;  %p824_p2 = scmp.lt.s32.totalorder %s1060_s5, %s822_s10  ;;  %p825_p3 = scmp.lt.s32.totalorder %s823_s11, %s817_s8 }
  0x36   : > { %476 = vperm.xlu0 %779, %v466_v8   ;;  %486 = vperm.xlu1 %780, %v468_v9   ;;  %p820_p0 = pneg %p819_p12 }
  0x37   : > { %p826_p5 = por %p825_p3, %p824_p2 }
  0x39   : > { %p827_p6 = pnand %p826_p5, %p820_p0 }
  0x3c   : > { %700 = vmatmul.mubr.msk.bf16.gmra.mxu0 %vm301_vm0, %v788_v10  ;;  %702 = vmatmul.mubr.msk.bf16.gmra.mxu1 %vm301_vm0, %v788_v10 }
  0xad   : > { %v472_v11 = vpop.permute.xlu0 %471  ;;  %v482_v29 = vpop.permute.xlu1 %481 }
  0xb1   : > { %v477_v16 = vpop.permute.xlu0 %476  ;;  %v487_v52 = vpop.permute.xlu1 %486 }
  0xf4   : > { %v342_v12 = vpop.f32.mrf.mxu0  ;;  %v395_v13 = vpop.f32.mrf.mxu1 }
  0xf5   : > { %v489_v14 = vadd.f32 %v472_v11, %v342_v12  ;;  %v491_v15 = vadd.f32 %v472_v11, %v395_v13 }
  0xf6   : > { %v344_v17 = vpop.f32.mrf.mxu0  ;;  %v397_v18 = vpop.f32.mrf.mxu1 }
  0xf7   : > { %vm505_vm1 = vcmp.ge.f32.partialorder %v489_v14, 0.0  ;;  %v521_v19 = vmul.f32 0.1, %v489_v14  ;;  %vm507_vm2 = vcmp.ge.f32.partialorder %v491_v15, 0.0  ;;  %v523_v20 = vmul.f32 0.1, %v491_v15 }
  0xf8   : > { %v490_v21 = vadd.f32 %v472_v11, %v344_v17  ;;  %v492_v22 = vadd.f32 %v472_v11, %v397_v18  ;;  %v346_v23 = vpop.f32.mrf.mxu0  ;;  %v399_v24 = vpop.f32.mrf.mxu1 }
  0xf9   : > { %v537_v25 = vsel %vm505_vm1, %v489_v14, %v521_v19  ;;  %v539_v26 = vsel %vm507_vm2, %v491_v15, %v523_v20  ;;  %v493_v27 = vadd.f32 %v477_v16, %v346_v23  ;;  %v495_v28 = vadd.f32 %v477_v16, %v399_v24 }
  0xfa   : > { %553 = vst [vmem:[%s1037_s30] sm:$0xff] %v537_v25  ;;  %555 = vst [vmem:[%s1037_s30 + $0x10] sm:$0xff] %v539_v26  ;;  %vm506_vm3 = vcmp.ge.f32.partialorder %v490_v21, 0.0  ;;  %v522_v30 = vmul.f32 0.1, %v490_v21  ;;  %vm508_vm4 = vcmp.ge.f32.partialorder %v492_v22, 0.0  ;;  %v348_v32 = vpop.f32.mrf.mxu0  ;;  %v401_v33 = vpop.f32.mrf.mxu1 }
  0xfb   : > { %v524_v31 = vmul.f32 0.1, %v492_v22  ;;  %vm509_vm5 = vcmp.ge.f32.partialorder %v493_v27, 0.0  ;;  %v525_v34 = vmul.f32 0.1, %v493_v27  ;;  %vm511_vm6 = vcmp.ge.f32.partialorder %v495_v28, 0.0 }
  0xfc   : > { %v527_v35 = vmul.f32 0.1, %v495_v28  ;;  %v538_v36 = vsel %vm506_vm3, %v490_v21, %v522_v30  ;;  %v494_v38 = vadd.f32 %v477_v16, %v348_v32  ;;  %v496_v39 = vadd.f32 %v477_v16, %v401_v33  ;;  %v352_v40 = vpop.f32.mrf.mxu0  ;;  %v405_v41 = vpop.f32.mrf.mxu1 }
  0xfd   : > { %v540_v37 = vsel %vm508_vm4, %v492_v22, %v524_v31  ;;  %554 = vst [vmem:[%s1037_s30 + $0x8] sm:$0xff] %v538_v36  ;;  %v541_v42 = vsel %vm509_vm5, %v493_v27, %v525_v34  ;;  %v497_v44 = vadd.f32 %v482_v29, %v352_v40  ;;  %v499_v45 = vadd.f32 %v482_v29, %v405_v41 }
  0xfe   : > { %556 = vst [vmem:[%s1037_s30 + $0x18] sm:$0xff] %v540_v37  ;;  %v543_v43 = vsel %vm511_vm6, %v495_v28, %v527_v35  ;;  %557 = vst [vmem:[%s1037_s30 + $0x20] sm:$0xff] %v541_v42  ;;  %vm510_vm7 = vcmp.ge.f32.partialorder %v494_v38, 0.0  ;;  %v526_v46 = vmul.f32 0.1, %v494_v38  ;;  %vm512_vm8 = vcmp.ge.f32.partialorder %v496_v39, 0.0  ;;  %v354_v48 = vpop.f32.mrf.mxu0  ;;  %v407_v49 = vpop.f32.mrf.mxu1 }
  0xff   : > { %559 = vst [vmem:[%s1037_s30 + $0x30] sm:$0xff] %v543_v43  ;;  %v528_v47 = vmul.f32 0.1, %v496_v39  ;;  %vm513_vm9 = vcmp.ge.f32.partialorder %v497_v44, 0.0  ;;  %v529_v50 = vmul.f32 0.1, %v497_v44  ;;  %v498_v55 = vadd.f32 %v482_v29, %v354_v48 }
 0x100   : > { %vm515_vm10 = vcmp.ge.f32.partialorder %v499_v45, 0.0  ;;  %v531_v51 = vmul.f32 0.1, %v499_v45  ;;  %v542_v53 = vsel %vm510_vm7, %v494_v38, %v526_v46  ;;  %v500_v56 = vadd.f32 %v482_v29, %v407_v49  ;;  %v356_v57 = vpop.f32.mrf.mxu0  ;;  %v409_v58 = vpop.f32.mrf.mxu1 }
 0x101   : > { %v544_v54 = vsel %vm512_vm8, %v496_v39, %v528_v47  ;;  %558 = vst [vmem:[%s1037_s30 + $0x28] sm:$0xff] %v542_v53  ;;  %v545_v59 = vsel %vm513_vm9, %v497_v44, %v529_v50  ;;  %v501_v61 = vadd.f32 %v487_v52, %v356_v57  ;;  %v503_v62 = vadd.f32 %v487_v52, %v409_v58 }
 0x102   : > { %560 = vst [vmem:[%s1037_s30 + $0x38] sm:$0xff] %v544_v54  ;;  %v547_v60 = vsel %vm515_vm10, %v499_v45, %v531_v51  ;;  %561 = vst [vmem:[%s1037_s30 + $0x40] sm:$0xff] %v545_v59  ;;  %vm514_vm11 = vcmp.ge.f32.partialorder %v498_v55, 0.0  ;;  %v530_v63 = vmul.f32 0.1, %v498_v55  ;;  %vm516_vm12 = vcmp.ge.f32.partialorder %v500_v56, 0.0  ;;  %v358_v1 = vpop.f32.mrf.mxu0  ;;  %v411_v2 = vpop.f32.mrf.mxu1 }
 0x103   : > { %563 = vst [vmem:[%s1037_s30 + $0x50] sm:$0xff] %v547_v60  ;;  %v532_v0 = vmul.f32 0.1, %v500_v56  ;;  %vm517_vm13 = vcmp.ge.f32.partialorder %v501_v61, 0.0  ;;  %v533_v3 = vmul.f32 0.1, %v501_v61  ;;  %v502_v7 = vadd.f32 %v487_v52, %v358_v1 }
 0x104   : > { %vm519_vm14 = vcmp.ge.f32.partialorder %v503_v62, 0.0  ;;  %v535_v4 = vmul.f32 0.1, %v503_v62  ;;  %v546_v5 = vsel %vm514_vm11, %v498_v55, %v530_v63  ;;  %v504_v8 = vadd.f32 %v487_v52, %v411_v2 }
 0x105   : > { %v548_v6 = vsel %vm516_vm12, %v500_v56, %v532_v0  ;;  %562 = vst [vmem:[%s1037_s30 + $0x48] sm:$0xff] %v546_v5  ;;  %v549_v9 = vsel %vm517_vm13, %v501_v61, %v533_v3  ;;  %vm518_vm15 = vcmp.ge.f32.partialorder %v502_v7, 0.0  ;;  %v534_v11 = vmul.f32 0.1, %v502_v7 }
 0x106   : > { %564 = vst [vmem:[%s1037_s30 + $0x58] sm:$0xff] %v548_v6  ;;  %v551_v10 = vsel %vm519_vm14, %v503_v62, %v535_v4  ;;  %565 = vst [vmem:[%s1037_s30 + $0x60] sm:$0xff] %v549_v9  ;;  %vm520_vm0 = vcmp.ge.f32.partialorder %v504_v8, 0.0  ;;  %v536_v12 = vmul.f32 0.1, %v504_v8 }
 0x107   : > { %567 = vst [vmem:[%s1037_s30 + $0x70] sm:$0xff] %v551_v10  ;;  %v550_v13 = vsel %vm518_vm15, %v502_v7, %v534_v11 }
 0x108   : > { %v552_v14 = vsel %vm520_vm0, %v504_v8, %v536_v12  ;;  %566 = vst [vmem:[%s1037_s30 + $0x68] sm:$0xff] %v550_v13 }
 0x109   : > { %568 = vst [vmem:[%s1037_s30 + $0x78] sm:$0xff] %v552_v14 }
 0x10a   : > { %830 = shalt.err (!%p827_p6)
}
 0x10b   : > { %s831_s18 = scalar_lea.hbm %s1058_s7, 2048  ;;  %s835_s22 = scalar_lea.hbm %s1113_s3, 4096 }
 0x10c   : > { %p832_p7 = scmp.ne.s32.totalorder %s1058_s7, %s831_s18  ;;  %p836_p13 = scmp.lt.s32.totalorder %s1058_s7, %s1113_s3 }
 0x10d   : > { %p837_p1 = scmp.lt.s32.totalorder %s835_s22, %s831_s18 }
 0x10e   : > { %p833_p10 = pnand %p832_p7, %p979_p9 }
 0x10f   : > { %p838_p8 = por %p837_p1, %p836_p13 }
 0x110   : > { %p834_p4 = pneg %p833_p10 }
 0x112   : > { %p839_p12 = pnand %p838_p8, %p834_p4 }
 0x114   : > { %842 = shalt.err (!%p839_p12)
}
 0x115   : > { %s905_s30 = smov 512   ;;  %s906_s4 = smov 1024  }
 0x116   : > { %s907_s15 = smov 32  }
 0x117   : > { %712 = dma.vmem_to_hbm [thread:$0]  (%p979_p9), %s1060_s5, 2048, %s1058_s7, %s570_s24, %s905_s30, %s906_s4, %s907_s15  }
 0x118 PF: > { %s598_s6 = sand.u32 1, %s877_s12   ;;  %p1119_p0 = scmp.ge.s32.totalorder %s897_s17, 2 }
 0x119   : > { %s599_s8 = scalar_lea.sflag [#allocation5], %s598_s6 }
 0x11a   : > { %p719_p2 = pnand %p1119_p0, %p986_p11 }
 0x11c   : > { %p720_p3 = pneg %p719_p2 }
 0x11e   : > { %872 = dma.done.wait (%p720_p3), %s599_s8, 2048  }
 0x11f   : > { %874 = vsyncadd (%p720_p3), %s599_s8, 4294965248  ;;  %s19_s17 = sadd.s32 1, %s897_s17   ;;  %s1120_s12 = smov %s881_s13 }
 0x120   : > { %p16_p5 = scmp.ge.s32.totalorder %s19_s17, 4   ;;  %s1121_s13 = smov %s885_s14 }
 0x121   : > { %s1122_s14 = smov %s984_s26  ;;  %s1123_s15 = smov %s893_s16 }
 0x122   : > { %s1124_s16 = smov %s1126_s20  ;;  %18 = sbr.rel (!%p16_p5) target bundleno = 6 (0x6), region = 88 }
 0x127   :  { %604 = vsyncpa [#allocation4], 1 }
 0x128   :  { %606 = vsyncpa [#allocation4 + $0x1], 1 }
 0x129   :  { %607 = vsyncpa [#allocation5], 1 }
 0x12a   :  { %609 = vsyncpa [#allocation5 + $0x1], 1 }

</bundles_post_ra>
